<compile_context>
chip_gen: v7x
topology: tpu7x:2x2x1
jax: 0.10.0
libtpu: 0.0.40
codegen_flags: <defaults>
</compile_context>

<pallas_src>
import functools

import jax
import jax.numpy as jnp
from jax import lax
from jax.experimental import pallas as pl
from jax.experimental.pallas import tpu as pltpu

_LANE = 128


def _round_up(x, m):
    return ((x + m - 1) // m) * m


def _divisors_desc(n):
    return [d for d in range(n, 0, -1) if n % d == 0]


def _vmem_limit_bytes():
    """Per-generation VMEM limit: ~100 MiB on v5e/v6e (128 MiB physical),
    ~56 MiB on v7x (64 MiB physical per TC)."""
    cap = 64 * 1024 * 1024  # conservative default (v7x per-TC VMEM)
    try:
        cap = int(pltpu.get_tpu_info().vmem_capacity_bytes)
    except Exception:
        pass
    return max(32 * 1024 * 1024, min(cap * 7 // 8, 100 * 1024 * 1024))


def _pick_row_tile(H, fixed_bytes, per_row_bytes, budget, rows_cap):
    """Largest divisor of H respecting the M cap and the per-step VMEM budget."""
    for th in _divisors_desc(H):
        if th <= rows_cap and fixed_bytes + th * per_row_bytes <= budget:
            return th
    return 1  # best effort; vmem_limit_bytes is the real guard


def _row_matmul_ok(H, W, C_in, C_out, itemsize, budget):
    """Use the packed row-matmul path only for skinny channels / small rows where
    the banded weight stays small and W*C_out is exactly lane-dense."""
    if (W * C_out) % _LANE != 0 or C_out > 32 or W > 64:
        return False
    wc_in, wc_out = (W + 2) * C_in, W * C_out
    wbig_b = 3 * wc_in * wc_out * itemsize
    img_b = (H + 2) * wc_in * itemsize
    out_b = H * wc_out * 4
    temps = 3 * H * wc_in * itemsize + 2 * out_b
    need = 2 * img_b + 2 * wbig_b + 2 * wc_out * 4 + 2 * out_b + temps
    return wbig_b <= 4 * 1024 * 1024 and need <= budget


# ---------------------------------------------------------------------------
# Kernels
# ---------------------------------------------------------------------------

def _cbn_row_matmul_kernel(x_ref, w_ref, bias_ref, o_ref, *, H):
    # x_ref:    (H+2, (W+2)*C_in)        padded image, row pixels flattened to lanes
    # w_ref:    (3, (W+2)*C_in, W*C_out) banded, BN-scale-folded weights (one per kh)
    # bias_ref: (1, W*C_out)             folded conv+BN bias, tiled over w
    # o_ref:    (H, W*C_out)             lane-dense f32 output slab
    xs = x_ref[...]
    acc = jnp.dot(xs[0:H], w_ref[0], preferred_element_type=jnp.float32)
    acc = acc + jnp.dot(xs[1:H + 1], w_ref[1], preferred_element_type=jnp.float32)
    acc = acc + jnp.dot(xs[2:H + 2], w_ref[2], preferred_element_type=jnp.float32)
    o_ref[...] = jnp.maximum(acc + bias_ref[0], 0.0).astype(o_ref.dtype)


def _cbn_im2col_kernel(x_ref, w_ref, bias_ref, o_ref, *, TH, W, C_in, C_out_p):
    # x_ref:    (H+2, W+2, C_in)       padded image (one batch element)
    # w_ref:    (3, 3*C_in, C_out_p)   BN-scale-folded taps; K index = kw*C_in + ci
    # bias_ref: (1, C_out_p)           folded conv+BN bias (zero on padded channels)
    # o_ref:    (TH, W, C_out_p)       f32 output row tile (C_out_p % 128 == 0)
    r = pl.program_id(1)
    row0 = pl.multiple_of(r * TH, TH)
    xs = x_ref[pl.ds(row0, TH + 2), :, :]                    # halo'd row slab
    # One 3-piece kw concat (lane axis), reused for all three kh row offsets.
    xw_cat = jnp.concatenate([xs[:, kw:kw + W, :] for kw in range(3)], axis=-1)
    lhs = xw_cat[0:TH].reshape(TH * W, 3 * C_in)
    acc = jnp.dot(lhs, w_ref[0], preferred_element_type=jnp.float32)
    for kh in (1, 2):                                        # static unroll
        lhs = xw_cat[kh:kh + TH].reshape(TH * W, 3 * C_in)
        acc = acc + jnp.dot(lhs, w_ref[kh], preferred_element_type=jnp.float32)
    out = jnp.maximum(acc + bias_ref[0], 0.0)                # BN(eval) bias + ReLU
    o_ref[...] = out.reshape(TH, W, C_out_p).astype(o_ref.dtype)


# ---------------------------------------------------------------------------
# Wrappers
# ---------------------------------------------------------------------------

def _cbn_row_matmul(x_pad, w_eff, bias, compute_dtype, vmem_limit):
    N, Hp, Wp, C_in = x_pad.shape
    H, W = Hp - 2, Wp - 2
    C_out = w_eff.shape[0]
    wc_in, wc_out = (W + 2) * C_in, W * C_out
    itemsize = jnp.dtype(compute_dtype).itemsize

    x2d = x_pad.reshape(N, H + 2, wc_in)

    # Banded weight: wbig[kh, w''*C_in+ci, w*C_out+co] = w_eff[co,ci,kh,w''-w]
    # when 0 <= w''-w <= 2, else 0.  Built with a one-hot einsum (exact).
    onehot = (jnp.arange(W + 2)[None, :, None]
              == (jnp.arange(W)[None, None, :] + jnp.arange(3)[:, None, None])
              ).astype(jnp.float32)                                  # (3, W+2, W)
    wbig = jnp.einsum('kuw,ochk->hucwo', onehot, w_eff)
    wbig = wbig.reshape(3, wc_in, wc_out).astype(compute_dtype)
    bias_row = jnp.tile(bias, (W,)).reshape(1, wc_out)               # f32

    kernel = functools.partial(_cbn_row_matmul_kernel, H=H)
    flops = 2 * N * H * 3 * wc_in * wc_out
    bytes_acc = (N * (H + 2) * wc_in * itemsize + int(wbig.size) * itemsize
                 + wc_out * 4 + N * H * wc_out * 4)

    out = pl.pallas_call(
        kernel,
        out_shape=jax.ShapeDtypeStruct((N, H, wc_out), jnp.float32),
        grid_spec=pltpu.PrefetchScalarGridSpec(
            num_scalar_prefetch=0,
            grid=(N,),
            in_specs=[
                pl.BlockSpec((None, H + 2, wc_in), lambda n: (n, 0, 0)),
                pl.BlockSpec((3, wc_in, wc_out), lambda n: (0, 0, 0)),
                pl.BlockSpec((1, wc_out), lambda n: (0, 0)),
            ],
            out_specs=pl.BlockSpec((None, H, wc_out), lambda n: (n, 0, 0)),
        ),
        compiler_params=pltpu.CompilerParams(
            dimension_semantics=("parallel",),
            vmem_limit_bytes=int(vmem_limit),
        ),
        cost_estimate=pl.CostEstimate(flops=int(flops), transcendentals=0,
                                      bytes_accessed=int(bytes_acc)),
    )(x2d, wbig, bias_row)

    out = out.reshape(N, H, W, C_out)            # lane dim was w*C_out + co
    return jnp.transpose(out, (0, 3, 1, 2))      # NHWC -> NCHW


def _cbn_im2col(x_pad, w_eff, bias, compute_dtype, vmem_limit, budget):
    N, Hp, Wp, C_in = x_pad.shape
    H, W = Hp - 2, Wp - 2
    C_out = w_eff.shape[0]
    C_out_p = _round_up(C_out, _LANE)            # lane-dense output width
    itemsize = jnp.dtype(compute_dtype).itemsize

    # (co, ci, kh, kw) -> (kh, kw, ci, co) -> (3, 3*C_in, C_out), pad to C_out_p.
    w3 = jnp.transpose(w_eff, (2, 3, 1, 0)).reshape(3, 3 * C_in, C_out)
    w3 = jnp.pad(w3, ((0, 0), (0, 0), (0, C_out_p - C_out))).astype(compute_dtype)
    bias_p = jnp.pad(bias, (0, C_out_p - C_out)).reshape(1, C_out_p)  # f32

    # Adaptive row tile: biggest divisor of H that keeps M = TH*W reasonable and
    # the per-step VMEM footprint inside the budget.
    img_b = (H + 2) * (W + 2) * C_in * itemsize
    w_b = 3 * 3 * C_in * C_out_p * itemsize
    fixed = 2 * img_b + 2 * w_b + 2 * C_out_p * 4
    per_row = (2 * W * C_out_p * 4              # double-buffered output tile
               + 6 * W * C_in * itemsize        # xw_cat + per-kh lhs temporaries
               + 2 * W * C_out_p * 4)           # f32 accumulator + epilogue temp
    rows_cap = max(1, 2048 // max(W, 1))
    TH = _pick_row_tile(H, fixed, per_row, budget, rows_cap)
    n_rt = H // TH

    # Single-buffer the whole-image block if double-buffering it would dominate
    # the budget (its block index is constant across the row-tile axis anyway).
    img_spec_kwargs = {}
    if 2 * img_b > budget // 2:
        img_spec_kwargs = dict(pipeline_mode=pl.Buffered(1))

    kernel = functools.partial(_cbn_im2col_kernel, TH=TH, W=W, C_in=C_in,
                               C_out_p=C_out_p)
    flops = 2 * N * H * W * 9 * C_in * C_out_p
    bytes_acc = (N * (H + 2) * (W + 2) * C_in * itemsize + w_b + C_out_p * 4
                 + N * H * W * C_out_p * 4)

    out = pl.pallas_call(
        kernel,
        out_shape=jax.ShapeDtypeStruct((N, H, W, C_out_p), jnp.float32),
        grid_spec=pltpu.PrefetchScalarGridSpec(
            num_scalar_prefetch=0,
            grid=(N, n_rt),
            in_specs=[
                pl.BlockSpec((None, H + 2, W + 2, C_in),
                             lambda n, r: (n, 0, 0, 0), **img_spec_kwargs),
                pl.BlockSpec((3, 3 * C_in, C_out_p), lambda n, r: (0, 0, 0)),
                pl.BlockSpec((1, C_out_p), lambda n, r: (0, 0)),
            ],
            out_specs=pl.BlockSpec((None, TH, W, C_out_p),
                                   lambda n, r: (n, r, 0, 0)),
        ),
        compiler_params=pltpu.CompilerParams(
            dimension_semantics=("parallel", "parallel"),
            vmem_limit_bytes=int(vmem_limit),
        ),
        cost_estimate=pl.CostEstimate(flops=int(flops), transcendentals=0,
                                      bytes_accessed=int(bytes_acc)),
    )(x_pad, w3, bias_p)

    return jnp.transpose(out[..., :C_out], (0, 3, 1, 2))    # drop pad, -> NCHW


def cbn_forward(x_nchw, w_oihw, conv_bias, gamma, beta, running_mean, running_var,
                eps=1e-5, compute_dtype=jnp.bfloat16):
    """Conv2d(3x3, pad=1) + BatchNorm2d(eval) + ReLU.  NCHW in / NCHW out.

    compute_dtype=jnp.bfloat16 (default, MXU-native) gives ~1e-2 relative
    accuracy vs. the f32 PyTorch module; pass jnp.float32 for a full-precision
    path."""
    N, C_in, H, W = x_nchw.shape
    C_out = w_oihw.shape[0]
    assert w_oihw.shape == (C_out, C_in, 3, 3), "CBN kernel expects 3x3 conv"

    # Fold BN (eval mode) into per-channel scale/bias, then fold the scale into
    # the conv weights in f32 BEFORE any low-precision cast.
    scale = (gamma / jnp.sqrt(running_var + eps)).astype(jnp.float32)
    bias = (conv_bias * scale + beta - running_mean * scale).astype(jnp.float32)
    w_eff = w_oihw.astype(jnp.float32) * scale[:, None, None, None]

    # NCHW -> NHWC, pad H/W by 1 (conv padding=1), cast to the compute dtype.
    x_nhwc = jnp.transpose(x_nchw, (0, 2, 3, 1))
    x_pad = jnp.pad(x_nhwc, ((0, 0), (1, 1), (1, 1), (0, 0))).astype(compute_dtype)

    vmem_limit = _vmem_limit_bytes()
    budget = (vmem_limit * 3) // 5   # headroom for compiler scratch / temporaries
    itemsize = jnp.dtype(compute_dtype).itemsize

    if _row_matmul_ok(H, W, C_in, C_out, itemsize, budget):
        return _cbn_row_matmul(x_pad, w_eff, bias, compute_dtype, vmem_limit)
    return _cbn_im2col(x_pad, w_eff, bias, compute_dtype, vmem_limit, budget)


# ---------------------------------------------------------------------------
# Reference + test
# ---------------------------------------------------------------------------

def _reference(x, w, conv_bias, gamma, beta, running_mean, running_var,
               eps=1e-5, match_bf16=False):
    """CBN in eval mode (BN folded, mathematically identical to the module).
    match_bf16=True rounds x and the folded weights to bf16 first, matching the
    kernel's operand precision (accumulation stays f32)."""
    scale = gamma / jnp.sqrt(running_var + eps)
    bias = conv_bias * scale + beta - running_mean * scale
    w_eff = w * scale[:, None, None, None]
    if match_bf16:
        x = x.astype(jnp.bfloat16).astype(jnp.float32)
        w_eff = w_eff.astype(jnp.bfloat16).astype(jnp.float32)
    y = lax.conv_general_dilated(
        x, w_eff, window_strides=(1, 1), padding="SAME",
        dimension_numbers=("NCHW", "OIHW", "NCHW"),
        precision=lax.Precision.HIGHEST)
    return jnp.maximum(y + bias[None, :, None, None], 0.0)


def _make_params(key, N, C_in, C_out, H, W):
    ks = jax.random.split(key, 7)
    x = jax.random.normal(ks[0], (N, C_in, H, W), dtype=jnp.float32)
    w = 0.1 * jax.random.normal(ks[1], (C_out, C_in, 3, 3), dtype=jnp.float32)
    conv_bias = 0.1 * jax.random.normal(ks[2], (C_out,), dtype=jnp.float32)
    gamma = 1.0 + 0.1 * jax.random.normal(ks[3], (C_out,), dtype=jnp.float32)
    beta = 0.1 * jax.random.normal(ks[4], (C_out,), dtype=jnp.float32)
    mean = 0.1 * jax.random.normal(ks[5], (C_out,), dtype=jnp.float32)
    var = jnp.abs(1.0 + 0.1 * jax.random.normal(ks[6], (C_out,), dtype=jnp.float32))
    return x, w, conv_bias, gamma, beta, mean, var


if __name__ == "__main__":
    root = jax.random.PRNGKey(0)
    k1, k2 = jax.random.split(root, 2)

    # Case 1: the module's typical skinny-channel shape -> packed row-matmul path
    # (lane-dense W*C_out = 128 output, no channel padding, 1 grid step / image).
    N, C_in, C_out, H, W = 2, 4, 8, 16, 16
    p1 = _make_params(k1, N, C_in, C_out, H, W)
    out1 = jax.block_until_ready(cbn_forward(*p1))
    assert out1.shape == (N, C_out, H, W)
    ref1_matched = _reference(*p1, match_bf16=True)
    assert jnp.allclose(out1, ref1_matched, rtol=2e-3, atol=2e-3), \
        "mismatch vs bf16-matched reference (row-matmul path)"
    ref1_f32 = _reference(*p1, match_bf16=False)
    # bf16 operands -> ~1% relative error vs the true f32 module output.
    assert jnp.allclose(out1, ref1_f32, rtol=5e-2, atol=5e-2), \
        "mismatch vs f32 module reference beyond bf16 tolerance"

    # Case 2: wider channels / non-lane-packable W*C_out -> general im2col path
    # (C_out zero-padded to 128 lanes, adaptive row tile).
    N2, C_in2, C_out2, H2, W2 = 2, 6, 40, 8, 12
    p2 = _make_params(k2, N2, C_in2, C_out2, H2, W2)
    out2 = jax.block_until_ready(cbn_forward(*p2))
    assert out2.shape == (N2, C_out2, H2, W2)
    ref2_matched = _reference(*p2, match_bf16=True)
    assert jnp.allclose(out2, ref2_matched, rtol=2e-3, atol=2e-3), \
        "mismatch vs bf16-matched reference (im2col path)"

    print("KERNEL_OK")
</pallas_src>

<mosaic_0001>
module attributes {stable_mosaic.version = 11 : i64} {
  func.func @_cbn_row_matmul_kernel(%arg0: i32, %arg1: memref<1x18x72xbf16, #tpu.memory_space<vmem>>, %arg2: memref<3x72x128xbf16, #tpu.memory_space<vmem>>, %arg3: memref<1x128xf32, #tpu.memory_space<vmem>>, %arg4: memref<1x16x128xf32, #tpu.memory_space<vmem>>) attributes {dimension_semantics = [#tpu.dimension_semantics<parallel>], iteration_bounds = array<i64: 2>, scalar_prefetch = 0 : i64, scratch_operands = 0 : i64, tpu.core_type = #tpu.core_type<tc>, window_params = [{transform_indices = @transform_0, window_bounds = array<i64: 1, 18, 72>}, {pipeline_mode = #tpu.pipeline_mode<synchronous>, transform_indices = @transform_1, window_bounds = array<i64: 3, 72, 128>}, {pipeline_mode = #tpu.pipeline_mode<synchronous>, transform_indices = @transform_2, window_bounds = array<i64: 1, 128>}, {transform_indices = @transform_3, window_bounds = array<i64: 1, 16, 128>}]} {
    %c0 = arith.constant 0 : index
    %c0_0 = arith.constant 0 : index
    %c0_1 = arith.constant 0 : index
    %0 = vector.load %arg1[%c0, %c0_0, %c0_1] : memref<1x18x72xbf16, #tpu.memory_space<vmem>>, vector<1x18x72xbf16>
    %1 = vector.shape_cast %0 : vector<1x18x72xbf16> to vector<18x72xbf16>
    %2 = vector.extract_strided_slice %1 {offsets = [0, 0], sizes = [16, 72], strides = [1, 1]} : vector<18x72xbf16> to vector<16x72xbf16>
    %c0_2 = arith.constant 0 : index
    %c0_3 = arith.constant 0 : index
    %c0_4 = arith.constant 0 : index
    %3 = vector.load %arg2[%c0_2, %c0_3, %c0_4] : memref<3x72x128xbf16, #tpu.memory_space<vmem>>, vector<1x72x128xbf16>
    %4 = vector.shape_cast %3 : vector<1x72x128xbf16> to vector<72x128xbf16>
    %cst = arith.constant dense<0.000000e+00> : vector<16x128xf32>
    %5 = tpu.matmul %2, %4, %cst {dimension_numbers = #tpu.dot_dimension_numbers<[1], [0], [0], [1], [0, 0, 1, 1], [], []>} : vector<16x72xbf16>, vector<72x128xbf16>, vector<16x128xf32> -> vector<16x128xf32>
    %6 = vector.extract_strided_slice %1 {offsets = [1, 0], sizes = [16, 72], strides = [1, 1]} : vector<18x72xbf16> to vector<16x72xbf16>
    %c1 = arith.constant 1 : index
    %c0_5 = arith.constant 0 : index
    %c0_6 = arith.constant 0 : index
    %7 = vector.load %arg2[%c1, %c0_5, %c0_6] : memref<3x72x128xbf16, #tpu.memory_space<vmem>>, vector<1x72x128xbf16>
    %8 = vector.shape_cast %7 : vector<1x72x128xbf16> to vector<72x128xbf16>
    %cst_7 = arith.constant dense<0.000000e+00> : vector<16x128xf32>
    %9 = tpu.matmul %6, %8, %cst_7 {dimension_numbers = #tpu.dot_dimension_numbers<[1], [0], [0], [1], [0, 0, 1, 1], [], []>} : vector<16x72xbf16>, vector<72x128xbf16>, vector<16x128xf32> -> vector<16x128xf32>
    %10 = arith.addf %5, %9 : vector<16x128xf32>
    %11 = vector.extract_strided_slice %1 {offsets = [2, 0], sizes = [16, 72], strides = [1, 1]} : vector<18x72xbf16> to vector<16x72xbf16>
    %c2 = arith.constant 2 : index
    %c0_8 = arith.constant 0 : index
    %c0_9 = arith.constant 0 : index
    %12 = vector.load %arg2[%c2, %c0_8, %c0_9] : memref<3x72x128xbf16, #tpu.memory_space<vmem>>, vector<1x72x128xbf16>
    %13 = vector.shape_cast %12 : vector<1x72x128xbf16> to vector<72x128xbf16>
    %cst_10 = arith.constant dense<0.000000e+00> : vector<16x128xf32>
    %14 = tpu.matmul %11, %13, %cst_10 {dimension_numbers = #tpu.dot_dimension_numbers<[1], [0], [0], [1], [0, 0, 1, 1], [], []>} : vector<16x72xbf16>, vector<72x128xbf16>, vector<16x128xf32> -> vector<16x128xf32>
    %15 = arith.addf %10, %14 : vector<16x128xf32>
    %c0_11 = arith.constant 0 : index
    %c0_12 = arith.constant 0 : index
    %16 = vector.load %arg3[%c0_11, %c0_12] : memref<1x128xf32, #tpu.memory_space<vmem>>, vector<1x128xf32>
    %17 = vector.shape_cast %16 : vector<1x128xf32> to vector<128xf32>
    %18 = vector.shape_cast %17 : vector<128xf32> to vector<1x128xf32>
    %19 = vector.broadcast %18 : vector<1x128xf32> to vector<16x128xf32>
    %20 = arith.addf %15, %19 : vector<16x128xf32>
    %cst_13 = arith.constant 0.000000e+00 : f32
    %21 = vector.broadcast %cst_13 : f32 to vector<16x128xf32>
    %22 = arith.maximumf %20, %21 : vector<16x128xf32>
    %c0_14 = arith.constant 0 : index
    %c0_15 = arith.constant 0 : index
    %c0_16 = arith.constant 0 : index
    %23 = vector.load %arg4[%c0_14, %c0_15, %c0_16] : memref<1x16x128xf32, #tpu.memory_space<vmem>>, vector<1x16x128xf32>
    %24 = vector.shape_cast %23 : vector<1x16x128xf32> to vector<16x128xf32>
    %25 = vector.shape_cast %22 : vector<16x128xf32> to vector<1x16x128xf32>
    tpu.vector_store %arg4[%c0_14, %c0_15, %c0_16], %25 {strides = array<i32>} : memref<1x16x128xf32, #tpu.memory_space<vmem>>, vector<1x16x128xf32>,
    return
  }
  func.func @transform_0(%arg0: i32) -> (i32, i32, i32) {
    %c0_i32 = arith.constant 0 : i32
    %c0_i32_0 = arith.constant 0 : i32
    %c0_i32_1 = arith.constant 0 : i32
    return %arg0, %c0_i32, %c0_i32_0 : i32, i32, i32
  }
  func.func @transform_1(%arg0: i32) -> (i32, i32, i32) {
    %c0_i32 = arith.constant 0 : i32
    %c0_i32_0 = arith.constant 0 : i32
    %c0_i32_1 = arith.constant 0 : i32
    %c0_i32_2 = arith.constant 0 : i32
    return %c0_i32, %c0_i32_0, %c0_i32_1 : i32, i32, i32
  }
  func.func @transform_2(%arg0: i32) -> (i32, i32) {
    %c0_i32 = arith.constant 0 : i32
    %c0_i32_0 = arith.constant 0 : i32
    %c0_i32_1 = arith.constant 0 : i32
    return %c0_i32, %c0_i32_0 : i32, i32
  }
  func.func @transform_3(%arg0: i32) -> (i32, i32, i32) {
    %c0_i32 = arith.constant 0 : i32
    %c0_i32_0 = arith.constant 0 : i32
    %c0_i32_1 = arith.constant 0 : i32
    return %arg0, %c0_i32, %c0_i32_0 : i32, i32, i32
  }
}

</mosaic_0001>

<bundles_post_ra>
// kernel: tpu_custom_call.1
= control target key start
LH: loop header
LB: loop body
LE: loop exit
PB: predicated region body
PF: predicated region fallthrough
CT: control target
= control target key end

     0   :  { %8 = vsyncpa [#allocation3], 0  ;;  %s1030_s0 = inlined_call_operand.vmem [shape: bf16[2,18,72], index: 0, kind: input, shape index: {}]   ;;  %s1031_s1 = inlined_call_operand.hbm [shape: bf16[3,72,128], index: 1, kind: input, shape index: {}]   ;;  %s1032_s2 = inlined_call_operand.vmem [shape: f32[1,128], index: 2, kind: input, shape index: {}]   ;;  %s1033_s3 = inlined_call_operand.hbm [shape: f32[2,16,128], index: 3, kind: output, shape index: {}]  }
   0x1   :  { %9 = vsyncpa [#allocation4], 0 }
   0x2   :  { %11 = vsyncpa [#allocation4 + $0x1], 0  ;;  %s861_s12 = smov 0   ;;  %s863_s13 = smov 0  }
   0x3   :  { %s865_s14 = smov 0   ;;  %s867_s15 = smov 0  }
   0x4 LB: > { %s882_s16 = sadd.s32 4294967295, %s831_s15   ;;  %s568_s17 = sadd.s32 4294967294, %s831_s15   ;;  %s831_s15 = sphi %s867_s15, %s1049_s15   ;;  %s827_s14 = sphi %s865_s14, %s1048_s14   ;;  %s823_s13 = sphi %s863_s13, %s1047_s13   ;;  %s819_s12 = sphi %s861_s12, %s1046_s12  }
   0x5   : > { %s886_s18 = sadd.s32 1, %s831_s15   ;;  %s92_s19 = sadd.s32 1, %s827_s14 }
   0x6   : > { %s89_s20 = ssub.s32 %s831_s15, %s886_s18  ;;  %p102_p0 = scmp.ne.s32.totalorder %s827_s14, %s823_s13 }
   0x7   : > { %p90_p1 = scmp.eq.s32.totalorder %s89_s20, 0  ;;  %p103_p2 = scmp.eq.s32.totalorder %s882_s16, 1 }
   0x8   : > { %p108_p3 = scmp.ne.s32.totalorder %s823_s13, %s819_s12  ;;  %p109_p4 = scmp.eq.s32.totalorder %s568_s17, 1 }
   0x9   : > { %s897_s21 = scalar_select %p90_p1, %s827_s14, %s92_s19  }
   0xa   : > { %p899_p5 = por %p103_p2, %p102_p0  ;;  %p903_p6 = por %p109_p4, %p108_p3 }
   0xb   : > { %p569_p7 = scmp.ge.s32.totalorder %s831_s15, 1  ;;  %p116_p8 = scmp.lt.s32.totalorder %s831_s15, 3 }
   0xc   : > { %s1037_s22 = scalar_select %p899_p5, 1, 0 }
   0xd   : > { %s1038_s23 = scalar_select %p903_p6, 1, 0 }
   0xe   : > { %p1034_p9 = scmp.eq.s32.totalorder %s882_s16, 0  ;;  %p910_p10 = pnand %p569_p7, %p116_p8 }
   0xf   : > { %s833_s25 = smov [#allocation2]   ;;  %s737_s30 = scalar_lea.hbm %s1031_s1, 1728 }
  0x10   : > { %s1039_s24 = scalar_select %p910_p10, 1, 0 }
  0x11   : > { %s128_s26 = sshll.u32 %s833_s25, 4  ;;  %p670_p11 = pneg %p910_p10  ;;  %s129_s26 = int_to_ptr.vmem [resolvable:$true] %s128_s26 }
  0x12   : > { %p738_p13 = scmp.ne.s32.totalorder %s1031_s1, %s737_s30  ;;  %p744_p3 = scmp.lt.u32.totalorder %s737_s30, %s1031_s1 }
  0x13   : > { %p918_p12 = pnand %p1034_p9, %p670_p11 }
  0x15   : > { %p739_p0 = pneg %p918_p12 }
  0x17   : > { %p740_p1 = pnand %p739_p0, %p738_p13 }
  0x19   : > { %p741_p2 = pneg %p740_p1 }
  0x1b   : > { %p746_p4 = pnand %p744_p3, %p741_p2 }
  0x1d   : > { %749 = shalt.err (!%p746_p4)
}
  0x1e   : > { %s750_s8 = scalar_lea.vmem %s129_s26, 1728  ;;  %p758_p9 = scmp.lt.s32.totalorder %s129_s26, %s129_s26 }
  0x1f   : > { %p751_p7 = scmp.ne.s32.totalorder %s129_s26, %s750_s8  ;;  %p759_p6 = scmp.lt.s32.totalorder %s750_s8, %s750_s8 }
  0x21   : > { %p753_p8 = pnand %p751_p7, %p739_p0  ;;  %p760_p5 = por %p759_p6, %p758_p9 }
  0x23   : > { %p754_p11 = pneg %p753_p8 }
  0x25   : > { %p761_p10 = pnand %p760_p5, %p754_p11 }
  0x27   : > { %764 = shalt.err (!%p761_p10)
}
  0x28   : > { %s834_s9 = smov 64   ;;  %s835_s10 = smov 4  }
  0x29   : > { %673 = dma.hbm_to_vmem [thread:$0]  (!%p918_p12), %s1031_s1, 1728, %s129_s26, [#allocation3], %s834_s9, %s834_s9, %s835_s10  }
  0x2a   : > { %p1041_p13 = scmp.ne.s32.totalorder %s1039_s24, 0 }
  0x2b   : > { %p1042_p1 = scmp.eq.s32.totalorder (!%p1041_p13), %s882_s16, 0 }
  0x2c   : > { %155 = sbr.rel (%p1041_p13) target bundleno = 329 (0x149), region = 32 }
  0x33   : > { %810 = dma.done.wait (%p1042_p1), [#allocation3], 1728   ;;  %p1043_p0 = pmov %p1042_p1 }
  0x34   : > { %v836_v0 = vmov 0.0   ;;  %vm837_vm0 = vmmov 0   ;;  %p179_p5 = scmp.lt.s32.totalorder %s882_s16, 1  ;;  %v720_v1 = vld [vmem:[#allocation2 + $0x24] sm:$0xff]   ;;  %v722_v3 = vld [vmem:[#allocation2 + $0x2c] sm:$0xff]   ;;  %v724_v5 = vld [vmem:[#allocation2 + $0x34] sm:$0xff]  }
  0x35   : > { %812 = vsyncadd (%p1043_p0), [#allocation3], 4294965568  ;;  %621 = vmatprep.subr.bf16.mxu0 %v836_v0  ;;  %635 = vmatprep.subr.bf16.mxu1 %v836_v0  ;;  %v721_v2 = vld [vmem:[#allocation2] sm:$0xff]   ;;  %v723_v4 = vld [vmem:[#allocation2 + $0x8] sm:$0xff]   ;;  %vm215_vm1 = vsmask.f32 7424 }
  0x36   : > { %631 = vmatprep.mubr.msk.bf16.mxu0 %vm837_vm0, %v836_v0  ;;  %645 = vmatprep.mubr.msk.bf16.mxu1 %vm837_vm0, %v836_v0  ;;  %s180_s19 = scalar_select %p179_p5, %s882_s16, 1  ;;  %v725_v6 = vld [vmem:[#allocation2 + $0x10] sm:$0xff]   ;;  %v726_v7 = vld [vmem:[#allocation2 + $0x3c] sm:$0xff]   ;;  %v728_v8 = vld [vmem:[#allocation2 + $0x44] ss:$0 sps:$4 sm:$0xff]   ;;  %vm259_vm2 = vcmask 1043456  }
  0x37   : > { %622 = vmatpush3.bf16.msra.mxu0 %v720_v1  ;;  %636 = vmatpush3.bf16.msra.mxu1 %v721_v2  ;;  %v727_v10 = vld [vmem:[#allocation2 + $0x18] sm:$0xff]   ;;  %v729_v12 = vld [vmem:[#allocation2 + $0x20] ss:$0 sps:$4 sm:$0xff]   ;;  %v261_v17 = vsel %vm259_vm2, %v728_v8, 0  ;;  %vm255_vm3 = vcmask 588800   ;;  %v732_v22 = vld [vmem:[#allocation2 + $0x48] sm:$0xff]  }
  0x38   : > { %623 = vmatprep.subr.bf16.mxu0 %v836_v0  ;;  %s663_s20 = smul.u32 12, %s180_s19  ;;  %637 = vmatprep.subr.bf16.mxu1 %v836_v0  ;;  %v334_v19 = vsel %vm259_vm2, %v729_v12, 0  ;;  %v733_v23 = vld [vmem:[#allocation2 + $0x50] sm:$0xff]   ;;  %v734_v24 = vld [vmem:[#allocation2 + $0x58] sm:$0xff]   ;;  %v735_v25 = vld [vmem:[#allocation2 + $0x60] sm:$0xff]   ;;  %vm387_vm4 = vcmask 1046528  }
  0x39   : > { %v736_v26 = vld [vmem:[#allocation2 + $0x68] ss:$0 sps:$4 sm:$0xff]   ;;  %s176_s27 = sand.u32 1, %s823_s13   ;;  %s602_s6 = sshll.u32 %s882_s16, 8 }
  0x3a   : > { %s183_s26 = scalar_lea.vmem %s1030_s0, %s663_s20  ;;  %v422_v29 = vsel %vm259_vm2, %v736_v26, 0  ;;  %s574_s28 = sshll.u32 %s176_s27, 4  ;;  %v596_v42 = vld [vmem:[%s1032_s2] ss:$0 sm:$0xff] }
  0x3b   : > { %624 = vmatpush3.bf16.msra.mxu0 %v722_v3  ;;  %638 = vmatpush3.bf16.msra.mxu1 %v723_v4  ;;  %v730_v9 = vld [vmem:[%s183_s26] sm:$0xff]   ;;  %v731_v11 = vld [vmem:[%s183_s26 + $0x8] ss:$0 sps:$4 sm:$0x11]   ;;  %s178_s4 = scalar_lea.vmem [#allocation5], %s574_s28  ;;  %s987_s9 = scalar_lea.hbm %s1033_s3, %s602_s6 }
  0x3c   : > { %625 = vmatprep.subr.bf16.mxu0 %v836_v0  ;;  %639 = vmatprep.subr.bf16.mxu1 %v836_v0  ;;  %v217_v13 = vshrl.u32 %v730_v9, 16  ;;  %v219_v14 = vshll.u32 %v730_v9, 16  ;;  %v224_v15 = vshll.u32 %v731_v11, 16  ;;  %v388_v27 = vrot.slane %v730_v9, 1  ;;  %s494_s5 = sshll.u32 %s178_s4, 4  ;;  %s989_s10 = scalar_lea.sflag [#allocation4], %s176_s27  ;;  %s982_s5 = int_to_ptr.vmem [resolvable:$true] %s494_s5 }
  0x3d   : > { %v389_v28 = vrot.slane %v731_v11, 1  ;;  %s765_s11 = scalar_lea.vmem %s982_s5, 256  ;;  %p1044_p9 = scmp.ne.s32.totalorder %s1037_s22, 0 }
  0x3e   : > { %v221_v16 = vrot.slane %v219_v14, 1  ;;  %v226_v18 = vrot.slane %v224_v15, 1  ;;  %p766_p6 = scmp.ne.s32.totalorder %s982_s5, %s765_s11  ;;  %s838_s16 = smov [#allocation5]  }
  0x3f   : > { %626 = vmatpush3.bf16.msra.mxu0 %v724_v5  ;;  %640 = vmatpush3.bf16.msra.mxu1 %v725_v6  ;;  %v390_v30 = vsel %vm387_vm4, %v388_v27, %v389_v28  ;;  %s769_s17 = sshll.u32 %s838_s16, 4  ;;  %s770_s17 = int_to_ptr.vmem [resolvable:$false] %s769_s17 }
  0x40   : > { %627 = vmatprep.subr.bf16.mxu0 %v836_v0  ;;  %641 = vmatprep.subr.bf16.mxu1 %v836_v0  ;;  %v222_v20 = vor.u32 %v221_v16, %v217_v13  ;;  %p767_p10 = pnand %p766_p6, %p1044_p9  ;;  %s771_s19 = scalar_lea.vmem %s770_s17, 512 }
  0x41   : > { %p772_p2 = scmp.lt.s32.totalorder %s982_s5, %s770_s17  ;;  %p773_p3 = scmp.lt.s32.totalorder %s771_s19, %s765_s11 }
  0x42   : > { %v227_v21 = vsel %vm215_vm1, %v222_v20, %v226_v18  ;;  %p768_p12 = pneg %p767_p10 }
  0x43   : > { %628 = vmatpush3.bf16.msra.mxu0 %v726_v7  ;;  %642 = vmatpush3.bf16.msra.mxu1 %v727_v10  ;;  %p774_p4 = por %p773_p3, %p772_p2 }
  0x44   : > { %629 = vmatprep.subr.bf16.mxu0 %v836_v0  ;;  %643 = vmatprep.subr.bf16.mxu1 %v836_v0 }
  0x45   : > { %p775_p7 = pnand %p774_p4, %p768_p12 }
  0x47   : > { %630 = vmatpush3.bf16.msra.mxu0 %v261_v17  ;;  %644 = vmatpush3.bf16.msra.mxu1 %v334_v19 }
  0x48   : > { %649 = vmatprep.subr.bf16.mxu0 %v836_v0 }
  0x4a   : > { %632 = vmatmul.mubr.msk.bf16.vlgmr.msra.gmra.mrb[0].mxu0 %vm255_vm3, %v227_v21  ;;  %646 = vmatmul.mubr.msk.bf16.vlgmr.msra.gmra.mrb[0].mxu1 %vm255_vm3, %v730_v9 }
  0x4b   : > { %650 = vmatpush3.bf16.msra.mxu0 %v732_v22  ;;  %659 = vmatprep.mubr.msk.bf16.mxu0 %vm837_vm0, %v836_v0 }
  0x4c   : > { %651 = vmatprep.subr.bf16.mxu0 %v836_v0 }
  0x4f   : > { %652 = vmatpush3.bf16.msra.mxu0 %v733_v23 }
  0x50   : > { %653 = vmatprep.subr.bf16.mxu0 %v836_v0 }
  0x53   : > { %654 = vmatpush3.bf16.msra.mxu0 %v734_v24 }
  0x54   : > { %655 = vmatprep.subr.bf16.mxu0 %v836_v0 }
  0x57   : > { %656 = vmatpush3.bf16.msra.mxu0 %v735_v25 }
  0x58   : > { %657 = vmatprep.subr.bf16.mxu0 %v836_v0 }
  0x5b   : > { %658 = vmatpush3.bf16.msra.mxu0 %v422_v29 }
  0x5e   : > { %660 = vmatmul.mubr.msk.bf16.vlgmr.msra.gmra.mrb[4].mxu0 %vm255_vm3, %v390_v30 }
 0x11d   : > { %v297_v31 = vpop.f32.mrb[0].mxu0  ;;  %v370_v32 = vpop.f32.mrb[0].mxu1 }
 0x11e   : > { %v633_v33 = vpop.f32.mrb[1].mxu0  ;;  %v371_v34 = vadd.f32 %v370_v32, %v297_v31  ;;  %v647_v35 = vpop.f32.mrb[1].mxu1 }
 0x11f   : > { %v300_v36 = vpop.f32.mrb[2].mxu0  ;;  %v373_v37 = vpop.f32.mrb[2].mxu1 }
 0x120   : > { %v634_v38 = vpop.f32.mrb[3].mxu0  ;;  %v374_v39 = vadd.f32 %v373_v37, %v300_v36  ;;  %v648_v40 = vpop.f32.mrb[3].mxu1 }
 0x131   : > { %v458_v41 = vpop.f32.mrb[4].mxu0 }
 0x132   : > { %v465_v43 = vadd.f32 %v458_v41, %v371_v34  ;;  %v661_v44 = vpop.f32.mrb[5].mxu0 }
 0x133   : > { %v461_v45 = vpop.f32.mrb[6].mxu0 }
 0x134   : > { %v474_v46 = vadd.f32 %v596_v42, %v465_v43  ;;  %v466_v47 = vadd.f32 %v461_v45, %v374_v39  ;;  %v662_v48 = vpop.f32.mrb[7].mxu0 }
 0x136   : > { %v476_v49 = vmax.f32 %v474_v46, 0.0  ;;  %v475_v50 = vadd.f32 %v596_v42, %v466_v47 }
 0x138   : > { %478 = vst [vmem:[%s178_s4] sm:$0xff] %v476_v49  ;;  %v477_v51 = vmax.f32 %v475_v50, 0.0 }
 0x13a   : > { %479 = vst [vmem:[%s178_s4 + $0x8] sm:$0xff] %v477_v51 }
 0x13b   : > { %778 = shalt.err (!%p775_p7)
}
 0x13c   : > { %s779_s20 = scalar_lea.hbm %s987_s9, 256  ;;  %s783_s26 = scalar_lea.hbm %s1033_s3, 512 }
 0x13d   : > { %p780_p8 = scmp.ne.s32.totalorder %s987_s9, %s779_s20  ;;  %p784_p1 = scmp.lt.u32.totalorder %s987_s9, %s1033_s3 }
 0x13e   : > { %p785_p0 = scmp.lt.u32.totalorder %s783_s26, %s779_s20  ;;  %p787_p6 = scmp.lt.u32.totalorder %s779_s20, %s987_s9 }
 0x13f   : > { %p781_p11 = pnand %p780_p8, %p1044_p9 }
 0x140   : > { %p786_p5 = por %p785_p0, %p784_p1 }
 0x141   : > { %p782_p13 = pneg %p781_p11 }
 0x142   : > { %p788_p10 = por %p787_p6, %p786_p5 }
 0x144   : > { %p789_p12 = pnand %p788_p10, %p782_p13 }
 0x146   : > { %792 = shalt.err (!%p789_p12)
}
 0x147   : > { %s839_s29 = smov 128   ;;  %s840_s30 = smov 8  }
 0x148   : > { %668 = dma.vmem_to_hbm [thread:$0]  (%p1044_p9), %s982_s5, 256, %s987_s9, %s989_s10, %s839_s29, %s839_s29, %s840_s30  }
 0x149 PF: > { %p680_p2 = scmp.ge.s32.totalorder %s831_s15, 2  ;;  %s509_s4 = sand.u32 1, %s819_s12  }
 0x14a   : > { %p1045_p3 = scmp.ne.s32.totalorder %s1038_s23, 0  ;;  %s510_s6 = scalar_lea.sflag [#allocation4], %s509_s4 }
 0x14c   : > { %p675_p4 = pnand %p680_p2, %p1045_p3 }
 0x14e   : > { %814 = dma.done.wait (!%p675_p4), %s510_s6, 256  }
 0x14f   : > { %816 = vsyncadd (!%p675_p4), %s510_s6, 4294967040  ;;  %p14_p7 = scmp.ge.s32.totalorder %s886_s18, 4   ;;  %s1046_s12 = smov %s823_s13 }
 0x150   : > { %s1047_s13 = smov %s827_s14  ;;  %s1048_s14 = smov %s897_s21 }
 0x151   : > { %s1049_s15 = smov %s886_s18  ;;  %16 = sbr.rel (!%p14_p7) target bundleno = 4 (0x4), region = 74 }
 0x158   :  { %515 = vsyncpa [#allocation3], 1 }
 0x159   :  { %517 = vsyncpa [#allocation3 + $0x1], 1 }
 0x15a   :  { %518 = vsyncpa [#allocation4], 1 }
 0x15b   :  { %520 = vsyncpa [#allocation4 + $0x1], 1 }

</bundles_post_ra>
